<compile_context>
chip_gen: v7x
topology: tpu7x:2x2x1
jax: 0.10.0
libtpu: 0.0.40
codegen_flags: <defaults>
</compile_context>

<pallas_src>
import functools
import math

import jax
import jax.numpy as jnp
from jax.experimental import pallas as pl
from jax.experimental.pallas import tpu as pltpu


_MAX_TILE_LANES = 8192  # lane tile cap; plenty to amortize ~0.35us/step overhead


# --------------------------------------------------------------------------
# helpers
# --------------------------------------------------------------------------
def _round_up(x, m):
    return ((x + m - 1) // m) * m


def _divisors(n):
    out = set()
    i = 1
    while i * i <= n:
        if n % i == 0:
            out.add(i)
            out.add(n // i)
        i += 1
    return sorted(out)


@functools.lru_cache(maxsize=1)
def _vmem_budget_bytes():
    """(scoped vmem limit, buffer planning budget), derived per chip generation."""
    try:
        cap = int(pltpu.get_tpu_info().vmem_capacity_bytes)
    except Exception:
        cap = None
    if not cap or cap <= 0:
        cap = 64 * 1024 * 1024  # conservative: v7x per-TensorCore VMEM
    try:
        if "v7" in jax.devices()[0].device_kind.lower():
            cap = min(cap, 64 * 1024 * 1024)
    except Exception:
        pass
    limit = min((cap * 3) // 4, 100 * 1024 * 1024)  # 48 MiB v7x, 96 MiB v5e/v6e
    budget = (limit * 4) // 5                       # headroom for Mosaic scratch
    return int(limit), int(budget)


# --------------------------------------------------------------------------
# kernel bodies
# --------------------------------------------------------------------------
def _conv1x1_silu(x, w, b, *, mxu_bf16):
    """x: (C, T), w: (Cout, C), b: (Cout, 1) f32 -> SiLU(w @ x + b) in f32."""
    if mxu_bf16 and x.dtype == jnp.float32:
        x = x.astype(jnp.bfloat16)
        w = w.astype(jnp.bfloat16)
    y = jnp.dot(w, x, preferred_element_type=jnp.float32)
    y = y + b.astype(jnp.float32)
    return y * jax.nn.sigmoid(y)  # SiLU in f32


def _conv_kernel(x_ref, w_ref, b_ref, o_ref, *, mxu_bf16):
    # x_ref: (1, C, ts); w_ref: (Cout, C); b_ref: (Cout, 1) f32; o_ref: (1, Cout, ts)
    y = _conv1x1_silu(x_ref[0], w_ref[...], b_ref[...], mxu_bf16=mxu_bf16)
    o_ref[0] = y.astype(o_ref.dtype)


def _conv_shuffle_kernel(x_ref, w_ref, b_ref, o_ref, *, rows, width, impl, mxu_bf16):
    # x_ref: (1, C, rows*width); o_ref: (1, C, 2*rows, 2*width) -- final layout.
    C = x_ref.shape[1]
    y = _conv1x1_silu(x_ref[0], w_ref[...], b_ref[...], mxu_bf16=mxu_bf16)  # (4C, rows*W)
    # Pixel shuffle inside the kernel: channel 4c+2i+j -> output (2r+i, 2w+j).
    if impl == "einshape":
        y = pltpu.einshape("(cij)(rw)->c(ri)(wj)", y, c=C, i=2, j=2, r=rows, w=width)
    else:  # "transpose"
        y = y.reshape(C, 2, 2, rows, width)
        y = jnp.transpose(y, (0, 3, 1, 4, 2))       # (C, rows, 2, W, 2)
        y = y.reshape(C, 2 * rows, 2 * width)
    o_ref[0] = y.astype(o_ref.dtype)


# --------------------------------------------------------------------------
# pallas_call builders
# --------------------------------------------------------------------------
def _call_unfused(x_flat, w, b2, *, ts, mxu_bf16):
    B, C, HW = x_flat.shape
    Cout = w.shape[0]
    limit, _ = _vmem_budget_bytes()
    kern = functools.partial(_conv_kernel, mxu_bf16=mxu_bf16)
    return pl.pallas_call(
        kern,
        out_shape=jax.ShapeDtypeStruct((B, Cout, HW), x_flat.dtype),
        grid_spec=pltpu.PrefetchScalarGridSpec(
            num_scalar_prefetch=0,
            grid=(B, HW // ts),
            in_specs=[
                pl.BlockSpec((1, C, ts), lambda bi, si: (bi, 0, si)),
                pl.BlockSpec((Cout, C), lambda bi, si: (0, 0)),
                pl.BlockSpec((Cout, 1), lambda bi, si: (0, 0)),
            ],
            out_specs=pl.BlockSpec((1, Cout, ts), lambda bi, si: (bi, 0, si)),
        ),
        compiler_params=pltpu.CompilerParams(
            dimension_semantics=("parallel", "parallel"),
            vmem_limit_bytes=limit,
        ),
    )(x_flat, w, b2)


def _call_fused(x_flat, w, b2, *, H, W, rows, impl, mxu_bf16, out_dtype):
    B, C, HW = x_flat.shape
    Cout = w.shape[0]
    ts = rows * W
    limit, _ = _vmem_budget_bytes()
    kern = functools.partial(_conv_shuffle_kernel, rows=rows, width=W,
                             impl=impl, mxu_bf16=mxu_bf16)
    return pl.pallas_call(
        kern,
        out_shape=jax.ShapeDtypeStruct((B, C, 2 * H, 2 * W), out_dtype),
        grid_spec=pltpu.PrefetchScalarGridSpec(
            num_scalar_prefetch=0,
            grid=(B, H // rows),
            in_specs=[
                pl.BlockSpec((1, C, ts), lambda bi, ri: (bi, 0, ri)),
                pl.BlockSpec((Cout, C), lambda bi, ri: (0, 0)),
                pl.BlockSpec((Cout, 1), lambda bi, ri: (0, 0)),
            ],
            out_specs=pl.BlockSpec((1, C, 2 * rows, 2 * W),
                                   lambda bi, ri: (bi, 0, ri, 0)),
        ),
        compiler_params=pltpu.CompilerParams(
            dimension_semantics=("parallel", "parallel"),
            vmem_limit_bytes=limit,
        ),
    )(x_flat, w, b2)


# --------------------------------------------------------------------------
# tile selection (VMEM-budget aware, divisor based -> no padding copies)
# --------------------------------------------------------------------------
def _unfused_cap_lanes(C, Cout, in_size, out_size, budget):
    # double-buffered in/out tiles + 2x f32 intermediate; weight double-buffered.
    per_lane = 2 * C * in_size + 2 * Cout * out_size + 2 * Cout * 4
    resident = 2 * Cout * C * in_size + 2 * Cout * 4
    avail = budget - resident
    if avail <= 0:
        return 128
    return max(128, min(avail // per_lane, _MAX_TILE_LANES))


def _pick_unfused_tile(HW, C, Cout, in_size, out_size, budget, prefer_split):
    cap = _unfused_cap_lanes(C, Cout, in_size, out_size, budget)
    legal = [d for d in _divisors(HW) if (d % 128 == 0 or d == HW) and d <= cap]
    if not legal:
        return None
    if prefer_split:
        split = [d for d in legal if d < HW]
        if split:
            return max(split)
    return max(legal)


def _pick_fused_rows(H, W, C, Cout, in_size, out_size, budget, prefer_split):
    # in + out double buffers + 3x f32 intermediate (matmul result + relayout temps)
    per_row = W * (2 * C * in_size + 2 * Cout * out_size + 3 * Cout * 4)
    resident = 2 * Cout * C * in_size + 2 * Cout * 4
    avail = budget - resident
    if avail <= 0:
        return None
    cap = min(avail // per_row, max(1, _MAX_TILE_LANES // W))
    if cap < 1:
        return None

    def legal(r):
        return ((r * W) % 128 == 0 or r == H) and ((2 * r) % 8 == 0 or r == H)

    cand = [r for r in _divisors(H) if r <= cap and legal(r)]
    if not cand:
        return None
    if prefer_split:
        split = [r for r in cand if r < H]
        if split:
            return max(split)
    return max(cand)


# --------------------------------------------------------------------------
# fused-path probe: pick an in-kernel shuffle impl that compiles AND is correct
# for this block signature on the current toolchain; otherwise return None.
# --------------------------------------------------------------------------
@functools.lru_cache(maxsize=None)
def _probe_fused_impl(C, Cout, rows, W, dtype_name, mxu_bf16):
    dtype = jnp.dtype(dtype_name)
    key = jax.random.PRNGKey(1234)
    kx, kw = jax.random.split(key)
    xp = jax.random.normal(kx, (2, C, rows, W), dtype=jnp.float32)
    wp = jax.random.uniform(kw, (Cout, C), minval=-0.5, maxval=0.5, dtype=jnp.float32)
    bp = jnp.linspace(-0.1, 0.1, Cout, dtype=jnp.float32)

    x_in = xp.astype(dtype)
    w_in = wp.astype(dtype)
    x32 = x_in.astype(jnp.float32)
    w32 = w_in.astype(jnp.float32)
    ref = jnp.einsum("oc,bcrw->borw", w32, x32) + bp.reshape(1, Cout, 1, 1)
    ref = ref * jax.nn.sigmoid(ref)
    ref = ref.reshape(2, C, 2, 2, rows, W)
    ref = jnp.transpose(ref, (0, 1, 4, 2, 5, 3)).reshape(2, C, 2 * rows, 2 * W)

    exact = (dtype == jnp.float32) and not mxu_bf16
    tol = 1e-4 if exact else 5e-2
    b2 = bp.reshape(Cout, 1)
    for impl in ("einshape", "transpose"):
        try:
            out = _call_fused(x_in.reshape(2, C, rows * W), w_in, b2,
                              H=rows, W=W, rows=rows, impl=impl,
                              mxu_bf16=mxu_bf16, out_dtype=dtype)
            out = jax.block_until_ready(out)
            if bool(jnp.allclose(out.astype(jnp.float32), ref, atol=tol, rtol=tol)):
                return impl
        except Exception:
            continue
    return None


# --------------------------------------------------------------------------
# parameter init (matches Upsample.init_conv_)
# --------------------------------------------------------------------------
def make_upsample_params(dim, key):
    """kaiming_uniform on (dim, dim, 1, 1), repeated 4x along out-channels
    ('o ... -> (o 4) ...'), bias = zeros."""
    fan_in = dim * 1 * 1
    bound = math.sqrt(6.0 / fan_in)
    w_base = jax.random.uniform(
        key, (dim, dim, 1, 1), minval=-bound, maxval=bound, dtype=jnp.float32
    )
    w_full = jnp.repeat(w_base, 4, axis=0)  # (4*dim, dim, 1, 1)
    bias = jnp.zeros((4 * dim,), dtype=jnp.float32)
    return w_full, bias


# --------------------------------------------------------------------------
# forward
# --------------------------------------------------------------------------
def upsample_forward(x, conv_weight, conv_bias, *, mxu_bf16=False):
    """x: (B, C, H, W) NCHW. conv_weight: (4C, C, 1, 1), conv_bias: (4C,).
    Returns (B, C, 2H, 2W).  Pass bf16 `x` for ~2x less HBM traffic; set
    mxu_bf16=True to run the matmul in bf16 on f32 inputs (v5e, large C)."""
    B, C, H, W = x.shape
    Cout = conv_weight.shape[0]  # = 4C
    HW = H * W
    in_size = jnp.dtype(x.dtype).itemsize
    out_size = in_size
    _, budget = _vmem_budget_bytes()
    prefer_split = (B == 1)

    w_mat = conv_weight.reshape(Cout, C).astype(x.dtype)
    b2 = conv_bias.astype(jnp.float32).reshape(Cout, 1)  # bias stays f32
    x_flat = x.reshape(B, C, HW)  # pure reshape, no data movement

    # ---- preferred: fully fused conv + SiLU + pixel shuffle ----------------
    rows = _pick_fused_rows(H, W, C, Cout, in_size, out_size, budget, prefer_split)
    if rows is not None:
        impl = _probe_fused_impl(C, Cout, rows, W, jnp.dtype(x.dtype).name,
                                 bool(mxu_bf16))
        if impl is not None:
            return _call_fused(x_flat, w_mat, b2, H=H, W=W, rows=rows, impl=impl,
                               mxu_bf16=mxu_bf16, out_dtype=x.dtype)

    # ---- fallback: conv + SiLU kernel, pixel shuffle as one XLA transpose --
    # TODO(synk): the stride-2 lane interleave of PixelShuffle falls back to a
    # single XLA transpose when the in-kernel relayout does not lower on this
    # toolchain (extra HBM read+write of the 4C tensor).
    ts = _pick_unfused_tile(HW, C, Cout, in_size, out_size, budget, prefer_split)
    if ts is None:
        # Ragged spatial extent (rare): pad to a 128 multiple, slice back.
        hw_pad = _round_up(HW, 128)
        cap = _unfused_cap_lanes(C, Cout, in_size, out_size, budget)
        cand = [d for d in _divisors(hw_pad) if d % 128 == 0 and d <= cap]
        ts = max(cand) if cand else 128
        x_call = jnp.pad(x_flat, ((0, 0), (0, 0), (0, hw_pad - HW)))
    else:
        hw_pad = HW
        x_call = x_flat

    y = _call_unfused(x_call, w_mat, b2, ts=ts, mxu_bf16=mxu_bf16)  # (B, 4C, hw_pad)
    if hw_pad != HW:
        y = y[:, :, :HW]

    r = 2
    y = y.reshape(B, C, r, r, H, W)
    y = jnp.transpose(y, (0, 1, 4, 2, 5, 3))  # (B, C, H, r, W, r)
    return y.reshape(B, C, H * r, W * r)


# --------------------------------------------------------------------------
if __name__ == "__main__":
    key = jax.random.PRNGKey(0)
    k_x, k_w = jax.random.split(key)

    B, dim, H, W = 2, 4, 16, 16
    x = jax.random.normal(k_x, (B, dim, H, W), dtype=jnp.float32)
    conv_weight, conv_bias = make_upsample_params(dim, k_w)

    fwd = jax.jit(upsample_forward)
    out = jax.block_until_ready(fwd(x, conv_weight, conv_bias))

    # f32 reference (1x1 conv + SiLU + pixel shuffle)
    ref = jnp.einsum("bchw,oc->bohw", x, conv_weight.reshape(4 * dim, dim)) + \
          conv_bias.reshape(1, 4 * dim, 1, 1)
    ref = ref * jax.nn.sigmoid(ref)
    ref = ref.reshape(B, dim, 2, 2, H, W)
    ref = jnp.transpose(ref, (0, 1, 4, 2, 5, 3)).reshape(B, dim, 2 * H, 2 * W)

    assert out.shape == (B, dim, 2 * H, 2 * W), out.shape
    assert bool(jnp.allclose(out, ref, atol=1e-5, rtol=1e-5)), \
        float(jnp.max(jnp.abs(out - ref)))

    # Recommended bf16 calling convention (halves HBM traffic); loose tolerance.
    x_bf = x.astype(jnp.bfloat16)
    out_bf = jax.block_until_ready(jax.jit(upsample_forward)(x_bf, conv_weight, conv_bias))
    x32 = x_bf.astype(jnp.float32)
    w32 = conv_weight.reshape(4 * dim, dim).astype(jnp.bfloat16).astype(jnp.float32)
    ref_bf = jnp.einsum("bchw,oc->bohw", x32, w32) + conv_bias.reshape(1, 4 * dim, 1, 1)
    ref_bf = ref_bf * jax.nn.sigmoid(ref_bf)
    ref_bf = ref_bf.reshape(B, dim, 2, 2, H, W)
    ref_bf = jnp.transpose(ref_bf, (0, 1, 4, 2, 5, 3)).reshape(B, dim, 2 * H, 2 * W)
    assert out_bf.shape == (B, dim, 2 * H, 2 * W)
    assert bool(jnp.allclose(out_bf.astype(jnp.float32), ref_bf, atol=2e-2, rtol=2e-2))

    print("KERNEL_OK")
</pallas_src>

<mosaic_0001>
module attributes {stable_mosaic.version = 11 : i64} {
  func.func @_conv_kernel(%arg0: i32, %arg1: i32, %arg2: memref<1x4x256xf32, #tpu.memory_space<vmem>>, %arg3: memref<16x4xf32, #tpu.memory_space<vmem>>, %arg4: memref<16x1xf32, #tpu.memory_space<vmem>>, %arg5: memref<1x16x256xf32, #tpu.memory_space<vmem>>) attributes {dimension_semantics = [#tpu.dimension_semantics<parallel>, #tpu.dimension_semantics<parallel>], iteration_bounds = array<i64: 2, 1>, scalar_prefetch = 0 : i64, scratch_operands = 0 : i64, tpu.core_type = #tpu.core_type<tc>, window_params = [{transform_indices = @transform_0, window_bounds = array<i64: 1, 4, 256>}, {pipeline_mode = #tpu.pipeline_mode<synchronous>, transform_indices = @transform_1, window_bounds = array<i64: 16, 4>}, {pipeline_mode = #tpu.pipeline_mode<synchronous>, transform_indices = @transform_2, window_bounds = array<i64: 16, 1>}, {transform_indices = @transform_3, window_bounds = array<i64: 1, 16, 256>}]} {
    %c0 = arith.constant 0 : index
    %c0_0 = arith.constant 0 : index
    %c0_1 = arith.constant 0 : index
    %0 = vector.load %arg2[%c0, %c0_0, %c0_1] : memref<1x4x256xf32, #tpu.memory_space<vmem>>, vector<1x4x256xf32>
    %1 = vector.shape_cast %0 : vector<1x4x256xf32> to vector<4x256xf32>
    %c0_2 = arith.constant 0 : index
    %c0_3 = arith.constant 0 : index
    %2 = vector.load %arg3[%c0_2, %c0_3] : memref<16x4xf32, #tpu.memory_space<vmem>>, vector<16x4xf32>
    %c0_4 = arith.constant 0 : index
    %c0_5 = arith.constant 0 : index
    %3 = vector.load %arg4[%c0_4, %c0_5] : memref<16x1xf32, #tpu.memory_space<vmem>>, vector<16x1xf32>
    %cst = arith.constant dense<0.000000e+00> : vector<16x256xf32>
    %4 = tpu.matmul %2, %1, %cst {dimension_numbers = #tpu.dot_dimension_numbers<[1], [0], [0], [1], [0, 0, 1, 1], [], []>} : vector<16x4xf32>, vector<4x256xf32>, vector<16x256xf32> -> vector<16x256xf32>
    %5 = vector.broadcast %3 : vector<16x1xf32> to vector<16x256xf32>
    %6 = arith.addf %4, %5 : vector<16x256xf32>
    %7 = arith.negf %6 : vector<16x256xf32>
    %8 = math.exp %7 : vector<16x256xf32>
    %cst_6 = arith.constant 1.000000e+00 : f32
    %9 = vector.broadcast %cst_6 : f32 to vector<16x256xf32>
    %10 = arith.addf %9, %8 : vector<16x256xf32>
    %11 = arith.divf %9, %10 : vector<16x256xf32>
    %12 = arith.mulf %6, %11 : vector<16x256xf32>
    %c0_7 = arith.constant 0 : index
    %c0_8 = arith.constant 0 : index
    %c0_9 = arith.constant 0 : index
    %13 = vector.load %arg5[%c0_7, %c0_8, %c0_9] : memref<1x16x256xf32, #tpu.memory_space<vmem>>, vector<1x16x256xf32>
    %14 = vector.shape_cast %13 : vector<1x16x256xf32> to vector<16x256xf32>
    %15 = vector.shape_cast %12 : vector<16x256xf32> to vector<1x16x256xf32>
    tpu.vector_store %arg5[%c0_7, %c0_8, %c0_9], %15 {strides = array<i32>} : memref<1x16x256xf32, #tpu.memory_space<vmem>>, vector<1x16x256xf32>,
    return
  }
  func.func @transform_0(%arg0: i32, %arg1: i32) -> (i32, i32, i32) {
    %c0_i32 = arith.constant 0 : i32
    %c0_i32_0 = arith.constant 0 : i32
    return %arg0, %c0_i32, %arg1 : i32, i32, i32
  }
  func.func @transform_1(%arg0: i32, %arg1: i32) -> (i32, i32) {
    %c0_i32 = arith.constant 0 : i32
    %c0_i32_0 = arith.constant 0 : i32
    %c0_i32_1 = arith.constant 0 : i32
    return %c0_i32, %c0_i32_0 : i32, i32
  }
  func.func @transform_2(%arg0: i32, %arg1: i32) -> (i32, i32) {
    %c0_i32 = arith.constant 0 : i32
    %c0_i32_0 = arith.constant 0 : i32
    %c0_i32_1 = arith.constant 0 : i32
    return %c0_i32, %c0_i32_0 : i32, i32
  }
  func.func @transform_3(%arg0: i32, %arg1: i32) -> (i32, i32, i32) {
    %c0_i32 = arith.constant 0 : i32
    %c0_i32_0 = arith.constant 0 : i32
    return %arg0, %c0_i32, %arg1 : i32, i32, i32
  }
}

</mosaic_0001>

<bundles_post_ra>
// kernel: upsample_forward.1
= control target key start
LH: loop header
LB: loop body
LE: loop exit
PB: predicated region body
PF: predicated region fallthrough
CT: control target
= control target key end

     0   :  { %s548_s12 = smov 0   ;;  %s550_s13 = smov 0   ;;  %s597_s0 = inlined_call_operand.vmem [shape: f32[2,4,256], index: 0, kind: input, shape index: {}]   ;;  %s598_s1 = inlined_call_operand.vmem [shape: f32[16,4], index: 1, kind: input, shape index: {}]   ;;  %s599_s2 = inlined_call_operand.vmem [shape: f32[16,1], index: 2, kind: input, shape index: {}]   ;;  %s600_s3 = inlined_call_operand.vmem [shape: f32[2,16,256], index: 3, kind: output, shape index: {}]  }
   0x1   :  { %s552_s14 = smov 0  }
   0x2 LB: > { %s25_s15 = sadd.s32 1, %s520_s13  ;;  %p439_p0 = scmp.ge.s32.totalorder %s524_s14, 1  ;;  %s524_s14 = sphi %s552_s14, %s13_s14   ;;  %s520_s13 = sphi %s550_s13, %s602_s13   ;;  %s516_s12 = sphi %s548_s12, %s601_s12  }
   0x3   : > { %p27_p1 = scmp.ge.s32.totalorder %s25_s15, 2  ;;  %p158_p2 = scmp.lt.s32.totalorder %s524_s14, 3 }
   0x5   : > { %s604_s15 = smov (%p27_p1, %s25_s15), 0  ;;  %p159_p3 = pnand %p439_p0, %p158_p2 }
   0x6   : > { %p191_p4 = scmp.lt.s32.totalorder (!%p159_p3), %s516_s12, 1  ;;  %v526_v0 = vmov (!%p159_p3), 0.0   ;;  %v213_v1 = vld [vmem:[%s599_s2] sm:$0xff] (!%p159_p3)  ;;  %v527_v2 = vmov (!%p159_p3), 0   ;;  %v214_v3 = vld [vmem:[%s599_s2 + $0x8] sm:$0xff] (!%p159_p3)  ;;  %vm234_vm0 = vcmask (!%p159_p3), 1043456  }
   0x7   : > { %162 = sbr.rel (%p159_p3) target bundleno = 268 (0x10c), region = 32  ;;  %303 = vmatprep.mubr.f32.mxu0 (!%p159_p3), %v526_v0  ;;  %309 = vmatprep.mubr.f32.mxu1 (!%p159_p3), %v526_v0  ;;  %v211_v6 = vld [vmem:[%s598_s1] sm:$0xff] (!%p159_p3)  ;;  %vm227_vm1 = vcmask (!%p159_p3), 31744   ;;  %v212_v7 = vld [vmem:[%s598_s1 + $0x8] sm:$0xff] (!%p159_p3) }
   0x8   : > { %484 = vset.pattern.permute.xlu0 (!%p159_p3), %v527_v2 }
   0x9   : > { %217 = vperm.xlu0 (!%p159_p3), %484, %v213_v1  }
   0xd   : > { %222 = vperm.xlu0 (!%p159_p3), %484, %v214_v3  }
   0xe   : > { %s606_s12 = smov (!%p191_p4, %s516_s12), 1 }
   0xf   : > { %s454_s18 = sshll.u32 %s606_s12, 3  ;;  %s455_s28 = sshll.u32 %s606_s12, 5 }
  0x10   : > { %s198_s23 = scalar_lea.vmem %s597_s0, %s454_s18  ;;  %s208_s4 = scalar_lea.vmem %s600_s3, %s455_s28 }
  0x11   : > { %v210_v4 = vld [vmem:[%s198_s23] sm:$0xff] }
  0x12   : > { %v226_v5 = vcombine.high %v210_v4, %v210_v4 }
  0x14   : > { %444 = vmatprep.subr.msk.mxu0 %vm234_vm0, %v226_v5  ;;  %456 = vmatprep.subr.msk.mxu1 %vm234_vm0, %v226_v5 }
  0x15   : > { %445 = vmatpush1.msk.msra.mxu0 %vm234_vm0, %v210_v4  ;;  %457 = vmatpush1.msk.msra.mxu1 %vm234_vm0, %v210_v4 }
  0x16   : > { %446 = vmatmul.mubr.msk.f32.vlgmr.msra.gmra.mrb[0].mxu0 %vm227_vm1, %v211_v6  ;;  %447 = vmatmul.mubr.msk.f32.vlgmr.msra.gmra.mrb[0].mxu1 %vm227_vm1, %v212_v7 }
  0x88   : > { %v218_v8 = vpop.permute.xlu0 %217 }
  0x8c   : > { %v223_v9 = vpop.permute.xlu0 %222 }
  0xe9   : > { %v305_v10 = vpop.f32.mrb[0].mxu0  ;;  %v311_v11 = vpop.f32.mrb[0].mxu1 }
  0xea   : > { %v306_v12 = vadd.f32 %v305_v10, %v218_v8  ;;  %v312_v13 = vadd.f32 %v311_v11, %v223_v9  ;;  %v307_v14 = vpop.f32.mrb[1].mxu0  ;;  %v313_v15 = vpop.f32.mrb[1].mxu1 }
  0xeb   : > { %v308_v16 = vadd.f32 %v307_v14, %v218_v8  ;;  %v314_v17 = vadd.f32 %v313_v15, %v223_v9 }
  0xec   : > { %v448_v18 = vmul.f32 -1.442695, %v306_v12  ;;  %v450_v19 = vmul.f32 -1.442695, %v312_v13 }
  0xed   : > { %v449_v20 = vmul.f32 -1.442695, %v308_v16  ;;  %v451_v21 = vmul.f32 -1.442695, %v314_v17 }
  0xee   : > { %486 = vpow2.f32 %v448_v18 }
  0xef   : > { %488 = vpow2.f32 %v450_v19 }
  0xf0   : > { %490 = vpow2.f32 %v449_v20 }
  0xf1   : > { %492 = vpow2.f32 %v451_v21 }
  0xf8   : > { %v487_v22 = vpop.eup %486 }
  0xf9   : > { %v489_v23 = vpop.eup %488  ;;  %v328_v24 = vadd.f32 1.0, %v487_v22 }
  0xfa   : > { %v491_v25 = vpop.eup %490  ;;  %v330_v26 = vadd.f32 1.0, %v489_v23 }
  0xfb   : > { %v493_v27 = vpop.eup %492  ;;  %494 = vrcp.f32 %v328_v24  ;;  %v329_v28 = vadd.f32 1.0, %v491_v25 }
  0xfc   : > { %496 = vrcp.f32 %v330_v26  ;;  %v331_v29 = vadd.f32 1.0, %v493_v27 }
  0xfd   : > { %498 = vrcp.f32 %v329_v28 }
  0xfe   : > { %500 = vrcp.f32 %v331_v29 }
 0x105   : > { %v495_v30 = vpop.eup %494 }
 0x106   : > { %v497_v31 = vpop.eup %496  ;;  %v340_v32 = vmul.f32 %v495_v30, %v306_v12 }
 0x107   : > { %v499_v33 = vpop.eup %498  ;;  %v342_v34 = vmul.f32 %v497_v31, %v312_v13 }
 0x108   : > { %v501_v35 = vpop.eup %500  ;;  %344 = vst [vmem:[%s208_s4] sm:$0xff] %v340_v32  ;;  %v341_v36 = vmul.f32 %v499_v33, %v308_v16 }
 0x109   : > { %346 = vst [vmem:[%s208_s4 + $0x10] sm:$0xff] %v342_v34  ;;  %v343_v37 = vmul.f32 %v501_v35, %v314_v17 }
 0x10a   : > { %345 = vst [vmem:[%s208_s4 + $0x8] sm:$0xff] %v341_v36 }
 0x10b   : > { %347 = vst [vmem:[%s208_s4 + $0x18] sm:$0xff] %v343_v37 }
 0x10c PF: > { %s13_s14 = sadd.s32 1, %s524_s14   ;;  %s601_s12 = smov %s520_s13 }
 0x10d   : > { %p10_p5 = scmp.ge.s32.totalorder %s13_s14, 4   ;;  %s602_s13 = smov %s604_s15 }
 0x10f   :  { %12 = sbr.rel (!%p10_p5) target bundleno = 2 (0x2), region = 62 }

</bundles_post_ra>
